<compile_context>
chip_gen: v6e
topology: v6e:2x2x1
jax: 0.10.0
libtpu: 0.0.40
codegen_flags: <defaults>
</compile_context>

<pallas_src>
import jax
import jax.numpy as jnp
from jax import lax
from jax.experimental import pallas as pl
from jax.experimental.pallas import tpu as pltpu


def _seqcel_kernel(pred_ref, tgt_ref, out_ref):
    # pred_ref: (R, C) in the input dtype; compute in f32.
    # tgt_ref:  (R, 1) int32; -1 marks a masked (t >= label_size) or padded row.
    # out_ref:  (1, 1, 1) f32 partial loss for this row tile.
    pred = pred_ref[...].astype(jnp.float32)                                # (R, C)
    tgt = tgt_ref[...]                                                      # (R, 1)
    R, C = pred.shape

    # Numerically-stable logsumexp over the class (lane) axis.
    m = jnp.max(pred, axis=-1, keepdims=True)                               # (R, 1)
    lse = m + jnp.log(jnp.sum(jnp.exp(pred - m), axis=-1, keepdims=True))   # (R, 1)

    # pred[r, tgt[r]] via where + lane-reduce (no one-hot materialization).
    class_ids = lax.broadcasted_iota(jnp.int32, (R, C), 1)
    correct = jnp.sum(jnp.where(class_ids == tgt, pred, 0.0),
                      axis=-1, keepdims=True)                               # (R, 1)

    per_row = lse - correct                                                 # (R, 1)
    valid = tgt >= 0
    partial = jnp.sum(jnp.where(valid, per_row, 0.0), axis=0, keepdims=True)  # (1, 1)
    out_ref[0] = partial


def _choose_row_tile(n_rows, n_classes, itemsize):
    """Pick a row-tile size targeting ~8 MiB of preds per block (x2 for double
    buffering) -- comfortably inside every generation's VMEM budget."""
    target_block_bytes = 8 << 20
    r = target_block_bytes // max(1, n_classes * itemsize)
    r = int(max(8, min(2048, r)))
    r = (r // 8) * 8
    if n_rows <= r:
        r = max(8, ((n_rows + 7) // 8) * 8)   # single tile, sublane-aligned
    return r


def seqcel(preds, targets, label_sizes, *, row_tile=None):
    """Pallas implementation of SeqCEL.forward.

    preds:       (B, T, C) float (f32 or bf16; kept in HBM dtype)
    targets:     (B, T)    int
    label_sizes: (B,)      int
    returns scalar float32 loss.
    """
    B, T, C = preds.shape
    N = B * T

    # Fold the per-sequence length mask into the targets: t >= label_size -> -1.
    valid = (jnp.arange(T, dtype=jnp.int32)[None, :]
             < label_sizes.astype(jnp.int32)[:, None])                      # (B, T)
    tgt = jnp.where(valid, targets.astype(jnp.int32), -1).reshape(N, 1)     # (N, 1)
    pred2 = preds.reshape(N, C)                                             # (N, C)

    R = row_tile if row_tile is not None else _choose_row_tile(
        N, C, jnp.dtype(preds.dtype).itemsize)

    n_pad = (-N) % R
    if n_pad:
        pred2 = jnp.pad(pred2, ((0, n_pad), (0, 0)))
        tgt = jnp.pad(tgt, ((0, n_pad), (0, 0)), constant_values=-1)
    G = (N + n_pad) // R

    partials = pl.pallas_call(
        _seqcel_kernel,
        out_shape=jax.ShapeDtypeStruct((G, 1, 1), jnp.float32),
        grid=(G,),
        in_specs=[
            pl.BlockSpec((R, C), lambda i: (i, 0)),
            pl.BlockSpec((R, 1), lambda i: (i, 0)),
        ],
        out_specs=pl.BlockSpec((1, 1, 1), lambda i: (i, 0, 0)),
        compiler_params=pltpu.CompilerParams(
            dimension_semantics=("parallel",),
            vmem_limit_bytes=48 << 20,
        ),
    )(pred2, tgt)

    return jnp.sum(partials)


def seqcel_ref(preds, targets, label_sizes):
    """Pure-JAX reference mirroring the PyTorch loop."""
    loss = jnp.float32(0.0)
    B = preds.shape[0]
    for b in range(B):
        ls = int(label_sizes[b])
        p = preds[b, :ls].astype(jnp.float32)
        t = targets[b, :ls]
        logz = jax.scipy.special.logsumexp(p, axis=-1)
        correct = jnp.take_along_axis(p, t[:, None].astype(jnp.int32), axis=-1)[:, 0]
        loss = loss + jnp.sum(logz - correct)
    return loss


if __name__ == "__main__":
    B, T, C = 2, 8, 32  # batch, max seq length, num classes

    key = jax.random.PRNGKey(0)
    k1, k2 = jax.random.split(key)
    preds = jax.random.normal(k1, (B, T, C), dtype=jnp.float32)
    targets = jax.random.randint(k2, (B, T), 0, C, dtype=jnp.int32)
    label_sizes = jnp.array([5, 8], dtype=jnp.int32)  # variable valid lengths

    ref = seqcel_ref(preds, targets, label_sizes)

    # Default (single large tile) path.
    loss = seqcel(preds, targets, label_sizes)
    jax.block_until_ready(loss)
    assert jnp.allclose(loss, ref, rtol=1e-5, atol=1e-5), (loss, ref)

    # Multi-tile path (forces >1 grid step, exercises per-tile partials).
    loss_mt = seqcel(preds, targets, label_sizes, row_tile=8)
    jax.block_until_ready(loss_mt)
    assert jnp.allclose(loss_mt, ref, rtol=1e-5, atol=1e-5), (loss_mt, ref)

    # bf16 preds stay bf16 in HBM; cast to f32 happens inside the kernel.
    preds_bf16 = preds.astype(jnp.bfloat16)
    loss_bf16 = seqcel(preds_bf16, targets, label_sizes)
    ref_bf16 = seqcel_ref(preds_bf16.astype(jnp.float32), targets, label_sizes)
    jax.block_until_ready(loss_bf16)
    assert jnp.allclose(loss_bf16, ref_bf16, rtol=2e-2, atol=2e-2), (loss_bf16, ref_bf16)

    print("KERNEL_OK")
</pallas_src>

<mosaic_0001>
module attributes {stable_mosaic.version = 11 : i64} {
  func.func @_seqcel_kernel(%arg0: i32, %arg1: memref<16x32xf32, #tpu.memory_space<vmem>>, %arg2: memref<16x1xi32, #tpu.memory_space<vmem>>, %arg3: memref<1x1x1xf32, #tpu.memory_space<vmem>>) attributes {dimension_semantics = [#tpu.dimension_semantics<parallel>], iteration_bounds = array<i64: 1>, scalar_prefetch = 0 : i64, scratch_operands = 0 : i64, tpu.core_type = #tpu.core_type<tc>, window_params = [{transform_indices = @transform_0, window_bounds = array<i64: 16, 32>}, {transform_indices = @transform_1, window_bounds = array<i64: 16, 1>}, {transform_indices = @transform_2, window_bounds = array<i64: 1, 1, 1>}]} {
    %c0 = arith.constant 0 : index
    %c0_0 = arith.constant 0 : index
    %0 = vector.load %arg1[%c0, %c0_0] : memref<16x32xf32, #tpu.memory_space<vmem>>, vector<16x32xf32>
    %c0_1 = arith.constant 0 : index
    %c0_2 = arith.constant 0 : index
    %1 = vector.load %arg2[%c0_1, %c0_2] : memref<16x1xi32, #tpu.memory_space<vmem>>, vector<16x1xi32>
    %cst = arith.constant dense<0xFF800000> : vector<16xf32>
    %2 = vector.multi_reduction <maximumf>, %0, %cst [1] : vector<16x32xf32> to vector<16xf32>
    %3 = vector.shape_cast %2 : vector<16xf32> to vector<16x1xf32>
    %4 = vector.broadcast %3 : vector<16x1xf32> to vector<16x32xf32>
    %5 = arith.subf %0, %4 : vector<16x32xf32>
    %6 = math.exp %5 : vector<16x32xf32>
    %cst_3 = arith.constant dense<0.000000e+00> : vector<16xf32>
    %7 = vector.multi_reduction <add>, %6, %cst_3 [1] : vector<16x32xf32> to vector<16xf32>
    %8 = vector.shape_cast %7 : vector<16xf32> to vector<16x1xf32>
    %9 = math.log %8 : vector<16x1xf32>
    %10 = arith.addf %3, %9 : vector<16x1xf32>
    %11 = tpu.iota {dimensions = array<i32: 1>} : vector<16x32xi32>
    %12 = vector.broadcast %1 : vector<16x1xi32> to vector<16x32xi32>
    %13 = arith.cmpi eq, %11, %12 : vector<16x32xi32>
    %cst_4 = arith.constant 0.000000e+00 : f32
    %14 = vector.broadcast %cst_4 : f32 to vector<16x32xf32>
    %15 = arith.select %13, %0, %14 : vector<16x32xi1>, vector<16x32xf32>
    %cst_5 = arith.constant dense<0.000000e+00> : vector<16xf32>
    %16 = vector.multi_reduction <add>, %15, %cst_5 [1] : vector<16x32xf32> to vector<16xf32>
    %17 = vector.shape_cast %16 : vector<16xf32> to vector<16x1xf32>
    %18 = arith.subf %10, %17 : vector<16x1xf32>
    %c0_i32 = arith.constant 0 : i32
    %19 = vector.broadcast %c0_i32 : i32 to vector<16x1xi32>
    %20 = arith.cmpi sge, %1, %19 : vector<16x1xi32>
    %cst_6 = arith.constant 0.000000e+00 : f32
    %21 = vector.broadcast %cst_6 : f32 to vector<16x1xf32>
    %22 = arith.select %20, %18, %21 : vector<16x1xi1>, vector<16x1xf32>
    %cst_7 = arith.constant dense<0.000000e+00> : vector<1xf32>
    %23 = vector.multi_reduction <add>, %22, %cst_7 [0] : vector<16x1xf32> to vector<1xf32>
    %24 = vector.shape_cast %23 : vector<1xf32> to vector<1x1xf32>
    %c0_8 = arith.constant 0 : index
    %c0_9 = arith.constant 0 : index
    %c0_10 = arith.constant 0 : index
    %25 = vector.load %arg3[%c0_8, %c0_9, %c0_10] : memref<1x1x1xf32, #tpu.memory_space<vmem>>, vector<1x1x1xf32>
    %26 = vector.shape_cast %25 : vector<1x1x1xf32> to vector<1x1xf32>
    %27 = vector.shape_cast %24 : vector<1x1xf32> to vector<1x1x1xf32>
    tpu.vector_store %arg3[%c0_8, %c0_9, %c0_10], %27 {strides = array<i32>} : memref<1x1x1xf32, #tpu.memory_space<vmem>>, vector<1x1x1xf32>,
    return
  }
  func.func @transform_0(%arg0: i32) -> (i32, i32) {
    %c0_i32 = arith.constant 0 : i32
    %c0_i32_0 = arith.constant 0 : i32
    return %arg0, %c0_i32 : i32, i32
  }
  func.func @transform_1(%arg0: i32) -> (i32, i32) {
    %c0_i32 = arith.constant 0 : i32
    %c0_i32_0 = arith.constant 0 : i32
    return %arg0, %c0_i32 : i32, i32
  }
  func.func @transform_2(%arg0: i32) -> (i32, i32, i32) {
    %c0_i32 = arith.constant 0 : i32
    %c0_i32_0 = arith.constant 0 : i32
    %c0_i32_1 = arith.constant 0 : i32
    return %arg0, %c0_i32, %c0_i32_0 : i32, i32, i32
  }
}

</mosaic_0001>

<bundles_post_ra>
// kernel: tpu_custom_call.1
= control target key start
LH: loop header
LB: loop body
LE: loop exit
PB: predicated region body
PF: predicated region fallthrough
CT: control target
= control target key end

     0   :  { %vm16_vm0 = vcmask 261120   ;;  %v125_v4 = vmov 0   ;;  %s163_s0 = inlined_call_operand.vmem [shape: f32[16,32], index: 0, kind: input, shape index: {}]   ;;  %s164_s1 = inlined_call_operand.vmem [shape: s32[16,1], index: 1, kind: input, shape index: {}]   ;;  %s165_s2 = inlined_call_operand.hbm [shape: f32[1,1,1], index: 2, kind: output, shape index: {}]  }
   0x1   :  { %v12_v0 = vld [vmem:[%s163_s0] sm:$0xff]  ;;  %v13_v1 = vld [vmem:[%s163_s0 + $0x8] sm:$0xff]  ;;  %93 = vset.pattern.permute.xlu1 %v125_v4  ;;  %94 = vset.pattern.permute.xlu0 %v125_v4 }
   0x2   :  { %v14_v2 = vld [vmem:[%s164_s1] sm:$0xff]  ;;  %v17_v3 = vsel %vm16_vm0, %v12_v0, -inf }
   0x3   :  { %7 = vsyncpa [#allocation3], 0  ;;  %18 = vmax.xlane.f32.xlu0 %v17_v3  ;;  %44 = vperm.xlu1 %93, %v14_v2   ;;  %v20_v5 = vsel %vm16_vm0, %v13_v1, -inf  ;;  %v15_v6 = vld [vmem:[%s164_s1 + $0x8] sm:$0xff]  ;;  %v41_v13 = vlaneseq  ;;  %vm61_vm3 = vcmp.ge.s32.totalorder %v14_v2, 0  ;;  %vm65_vm5 = vcmask 7168  }
   0x4   :  { %vm62_vm4 = vcmp.ge.s32.totalorder %v15_v6, 0  ;;  %s126_s0 = smov [#allocation2]   ;;  %vm75_vm6 = vcmask 0  }
   0x5   :  { %v42_v15 = vand.u32 127, %v41_v13  ;;  %s83_s1 = sshll.u32 %s126_s0, 4  ;;  %s84_s1 = int_to_ptr.vmem [resolvable:$true] %s83_s1 }
   0x6   :  { %s103_s17 = scalar_lea.vmem %s84_s1, 16  ;;  %s107_s18 = scalar_lea.vmem %s84_s1, 32 }
   0x7   :  { %21 = vmax.xlane.f32.xlu0 %v20_v5  ;;  %47 = vperm.xlu1 %93, %v15_v6   ;;  %p104_p0 = scmp.ne.s32.totalorder %s84_s1, %s103_s17  ;;  %p108_p1 = scmp.lt.s32.totalorder %s84_s1, %s84_s1 }
   0x8   :  { %p109_p2 = scmp.lt.s32.totalorder %s107_s18, %s103_s17 }
   0xa   :  { %p110_p3 = por %p109_p2, %p108_p1 }
   0xc   :  { %p111_p4 = pnand %p110_p3, %p104_p0 }
  0x7e   :  { %v45_v14 = vpop.permute.xlu1 %44 }
  0x7f   :  { %vm49_vm1 = vcmp.eq.s32.totalorder %v42_v15, %v45_v14 }
  0x80   :  { %v51_v18 = vsel %vm49_vm1, %v12_v0, 0.0 }
  0x81   :  { %v53_v20 = vsel %vm16_vm0, %v51_v18, 0.0 }
  0x82   :  { %v48_v16 = vpop.permute.xlu1 %47 }
  0x83   :  { %vm50_vm2 = vcmp.eq.s32.totalorder %v42_v15, %v48_v16 }
  0x84   :  { %v52_v22 = vsel %vm50_vm2, %v13_v1, 0.0 }
  0x85   :  { %v56_v24 = vsel %vm16_vm0, %v52_v22, 0.0 }
  0x8c   :  { %v19_v7 = vpop.xlane.xlu0 %18 }
  0x8d   :  { %v23_v8 = vsub.f32 %v12_v0, %v19_v7 }
  0x8f   :  { %v25_v9 = vmul.f32 1.442695, %v23_v8 }
  0x90   :  { %v22_v10 = vpop.xlane.xlu0 %21 }
  0x91   :  { %95 = vpow2.f32 %v25_v9  ;;  %v24_v11 = vsub.f32 %v13_v1, %v22_v10 }
  0x93   :  { %v27_v12 = vmul.f32 1.442695, %v24_v11 }
  0x95   :  { %97 = vpow2.f32 %v27_v12 }
  0x9e   :  { %v96_v17 = vpop.eup %95 }
  0x9f   :  { %v29_v19 = vsel %vm16_vm0, %v96_v17, 0.0 }
  0xa0   :  { %30 = vadd.xlane.f32.xlu0 %v29_v19 }
  0xa2   :  { %v98_v21 = vpop.eup %97 }
  0xa3   :  { %v32_v23 = vsel %vm16_vm0, %v98_v21, 0.0 }
  0xa4   :  { %33 = vadd.xlane.f32.xlu1 %v32_v23  ;;  %54 = vadd.xlane.f32.xlu0 %v53_v20 }
  0xa8   :  { %57 = vadd.xlane.f32.xlu0 %v56_v24 }
 0x129   :  { %v31_v25 = vpop.xlane.xlu0 %30 }
 0x12a   :  { %99 = vlog2.f32 %v31_v25 }
 0x12d   :  { %v34_v26 = vpop.xlane.xlu1 %33  ;;  %v55_v29 = vpop.xlane.xlu0 %54 }
 0x12e   :  { %101 = vlog2.f32 %v34_v26 }
 0x131   :  { %v58_v35 = vpop.xlane.xlu0 %57 }
 0x137   :  { %v100_v27 = vpop.eup %99 }
 0x138   :  { %v36_v28 = vmul.f32 0.6931472, %v100_v27 }
 0x13a   :  { %v39_v30 = vadd.f32 %v36_v28, %v19_v7 }
 0x13b   :  { %v102_v31 = vpop.eup %101 }
 0x13c   :  { %v38_v32 = vmul.f32 0.6931472, %v102_v31  ;;  %v59_v33 = vsub.f32 %v39_v30, %v55_v29 }
 0x13e   :  { %v40_v34 = vadd.f32 %v38_v32, %v22_v10  ;;  %v63_v36 = vsel %vm61_vm3, %v59_v33, 0.0 }
 0x13f   :  { %v66_v39 = vsel %vm65_vm5, %v63_v36, 0.0 }
 0x140   :  { %v60_v37 = vsub.f32 %v40_v34, %v58_v35 }
 0x142   :  { %v64_v38 = vsel %vm62_vm4, %v60_v37, 0.0 }
 0x143   :  { %v67_v40 = vsel %vm65_vm5, %v64_v38, 0.0 }
 0x144   :  { %v68_v41 = vadd.f32 %v67_v40, %v66_v39 }
 0x146   :  { %v69_v42 = vrot.slane %v68_v41, 4 }
 0x148   :  { %v70_v43 = vadd.f32 %v69_v42, %v68_v41 }
 0x14a   :  { %v71_v44 = vrot.slane %v70_v43, 2 }
 0x14c   :  { %v72_v45 = vadd.f32 %v71_v44, %v70_v43 }
 0x14e   :  { %v73_v46 = vrot.slane %v72_v45, 1 }
 0x150   :  { %v74_v47 = vadd.f32 %v73_v46, %v72_v45 }
 0x152   :  { %76 = vst.msk [vmem:[#allocation2] sm:$0x1] %vm75_vm6, %v74_v47 }
 0x153   :  { %114 = shalt.err (!%p111_p4)
}
 0x154   :  { %86 = dma.vmem_to_hbm [thread:$0]  %s84_s1, 16, %s165_s2, [#allocation3]  }
 0x155   :  { %123 = dma.done.wait [#allocation3], 16  }
 0x156   :  { %124 = vsyncadd [#allocation3], 4294967280 }
 0x157   :  { %90 = vsyncpa [#allocation3], 1 }

</bundles_post_ra>
